<compile_context>
chip_gen: v7x
topology: tpu7x:2x2x1
jax: 0.10.0
libtpu: 0.0.40
codegen_flags: <defaults>
</compile_context>

<pallas_src>
import jax
import jax.numpy as jnp
from jax.experimental import pallas as pl
from jax.experimental.pallas import tpu as pltpu


def _masked_nll_kernel(pred_ref, tgt_ref, wm_ref, out_ref):
    j = pl.program_id(1)  # inner (reduction) axis

    @pl.when(j == 0)
    def _():
        out_ref[...] = jnp.zeros_like(out_ref)

    pred = pred_ref[...].astype(jnp.float32)          # (TN, C) log-probs
    tgt = tgt_ref[...]                                # (TN, 1) int32
    wm = wm_ref[...]                                  # (TN, 1) f32 = weight[t]*mask (0 on pad rows)

    # gather pred[i, t_i] via one-hot select + lane reduce
    cls = jax.lax.broadcasted_iota(jnp.int32, pred.shape, 1)
    picked = jnp.sum(jnp.where(cls == tgt, pred, 0.0), axis=-1, keepdims=True)  # (TN, 1)

    # partial numerator for this block, accumulated into the resident out slab
    out_ref[...] += jnp.sum(-wm * picked)


def _round_up(x, m):
    return ((x + m - 1) // m) * m


def masked_nll_loss(pred, target, mask, weight=None, *, tile_n=None, max_parallel=2):
    """pred: (N, C) log-probs; target: (N,) int; mask: (B, L) with B*L == N."""
    n, c = pred.shape
    itemsize = jnp.dtype(pred.dtype).itemsize
    sub = {1: 32, 2: 16}.get(itemsize, 8)             # sublane packing per dtype

    # --- wrapper-side gather of weight[target]*mask and the denominator -----
    mask_flat = mask.reshape(-1).astype(jnp.float32)
    if weight is None:
        wm = mask_flat
        den = jnp.sum(mask.astype(jnp.float32))
    else:
        wm = weight.astype(jnp.float32)[target] * mask_flat
        den = jnp.sum(wm)

    # --- row tile: ~4 MiB pred block (HBM-bound), multiple of sublane -------
    if tile_n is None:
        target_block_bytes = 4 * 1024 * 1024
        tile_n = max(sub, min(2048, target_block_bytes // max(1, c * itemsize)))
    tile_n = max(sub, (tile_n // sub) * sub)
    tile_n = min(tile_n, _round_up(n, sub))

    # --- grid: (parallel row-chunks, sequential row-blocks per chunk) -------
    r = pl.cdiv(n, tile_n)                            # total row blocks
    p = max_parallel if r >= max_parallel else 1      # outer 'parallel' axis (2 TCs on v7x)
    rp = pl.cdiv(r, p)                                # inner 'arbitrary' axis length
    nf = p * rp * tile_n                              # padded row count

    tgt2 = target.reshape(n, 1).astype(jnp.int32)
    wm2 = wm.reshape(n, 1)
    if nf != n:
        padr = nf - n
        pred = jnp.pad(pred, ((0, padr), (0, 0)))
        tgt2 = jnp.pad(tgt2, ((0, padr), (0, 0)))
        wm2 = jnp.pad(wm2, ((0, padr), (0, 0)))       # zero scale -> pad rows contribute 0

    row_map = lambda pi, ji: (pi * rp + ji, 0)

    partials = pl.pallas_call(
        _masked_nll_kernel,
        out_shape=jax.ShapeDtypeStruct((8, 128 * p), jnp.float32),
        grid_spec=pltpu.PrefetchScalarGridSpec(
            num_scalar_prefetch=0,
            grid=(p, rp),
            in_specs=[
                pl.BlockSpec((tile_n, c), row_map),   # pred, kept in its upstream dtype
                pl.BlockSpec((tile_n, 1), row_map),   # target
                pl.BlockSpec((tile_n, 1), row_map),   # weight[target] * mask
            ],
            # one lane-dense (8,128) accumulator slab per parallel chunk
            out_specs=pl.BlockSpec((8, 128), lambda pi, ji: (0, pi)),
        ),
        compiler_params=pltpu.CompilerParams(
            dimension_semantics=("parallel", "arbitrary"),
            vmem_limit_bytes=48 * 1024 * 1024),
    )(pred, tgt2, wm2)

    # each slab is the replicated partial numerator of its chunk
    num = jnp.sum(partials.reshape(8, p, 128)[0, :, 0])
    return num / den


def _reference(pred, target, mask, weight=None):
    m = mask.reshape(-1).astype(jnp.float32)
    picked = jnp.take_along_axis(pred.astype(jnp.float32),
                                 target.reshape(-1, 1), axis=1)[:, 0]
    if weight is None:
        return -jnp.sum(m * picked) / jnp.sum(mask)
    w_t = weight[target]
    return -jnp.sum(w_t * m * picked) / jnp.sum(w_t * m)


if __name__ == "__main__":
    key = jax.random.PRNGKey(0)
    B, L, C = 2, 8, 6
    N = B * L

    k1, k2, k3 = jax.random.split(key, 3)
    logits = jax.random.normal(k1, (N, C), jnp.float32)
    pred = jax.nn.log_softmax(logits, axis=-1)                 # NLLLoss takes log-probs
    target = jax.random.randint(k2, (N,), 0, C, jnp.int32)
    mask = (jax.random.uniform(k3, (B, L)) > 0.3).astype(jnp.float32)

    # default module configuration: weight=None
    loss = masked_nll_loss(pred, target, mask, weight=None)
    jax.block_until_ready(loss)
    ref = _reference(pred, target, mask, None)
    assert jnp.allclose(loss, ref, atol=1e-5, rtol=1e-5), (loss, ref)

    # weighted path
    w = jnp.linspace(0.5, 1.5, C, dtype=jnp.float32)
    loss_w = masked_nll_loss(pred, target, mask, weight=w)
    jax.block_until_ready(loss_w)
    ref_w = _reference(pred, target, mask, w)
    assert jnp.allclose(loss_w, ref_w, atol=1e-5, rtol=1e-5), (loss_w, ref_w)

    # bf16 pred passes straight through HBM (no wrapper up-cast)
    pred_bf16 = pred.astype(jnp.bfloat16)
    loss_bf = masked_nll_loss(pred_bf16, target, mask, weight=None)
    jax.block_until_ready(loss_bf)
    ref_bf = _reference(pred_bf16, target, mask, None)
    assert jnp.allclose(loss_bf, ref_bf, atol=2e-2, rtol=2e-2), (loss_bf, ref_bf)

    # multi-block / parallel-axis / padding path (N = 21 does not divide tile 8)
    B2, L2, C2 = 3, 7, 10
    N2 = B2 * L2
    k4, k5, k6 = jax.random.split(jax.random.PRNGKey(1), 3)
    pred2 = jax.nn.log_softmax(jax.random.normal(k4, (N2, C2), jnp.float32), -1)
    target2 = jax.random.randint(k5, (N2,), 0, C2, jnp.int32)
    mask2 = (jax.random.uniform(k6, (B2, L2)) > 0.4).astype(jnp.float32)
    loss2 = masked_nll_loss(pred2, target2, mask2, weight=None, tile_n=8)
    jax.block_until_ready(loss2)
    ref2 = _reference(pred2, target2, mask2, None)
    assert jnp.allclose(loss2, ref2, atol=1e-5, rtol=1e-5), (loss2, ref2)

    print("KERNEL_OK")
</pallas_src>

<mosaic_0001>
module attributes {stable_mosaic.version = 11 : i64} {
  func.func @_masked_nll_kernel(%arg0: i32, %arg1: i32, %arg2: memref<16x6xf32, #tpu.memory_space<vmem>>, %arg3: memref<16x1xi32, #tpu.memory_space<vmem>>, %arg4: memref<16x1xf32, #tpu.memory_space<vmem>>, %arg5: memref<8x128xf32, #tpu.memory_space<vmem>>) attributes {dimension_semantics = [#tpu.dimension_semantics<parallel>, #tpu.dimension_semantics<arbitrary>], iteration_bounds = array<i64: 1, 1>, scalar_prefetch = 0 : i64, scratch_operands = 0 : i64, tpu.core_type = #tpu.core_type<tc>, window_params = [{transform_indices = @transform_0, window_bounds = array<i64: 16, 6>}, {transform_indices = @transform_1, window_bounds = array<i64: 16, 1>}, {transform_indices = @transform_2, window_bounds = array<i64: 16, 1>}, {transform_indices = @transform_3, window_bounds = array<i64: 8, 128>}]} {
    %c0_i32 = arith.constant 0 : i32
    %0 = arith.cmpi eq, %arg1, %c0_i32 : i32
    %1 = arith.extui %0 : i1 to i32
    %c0_i32_0 = arith.constant 0 : i32
    %2 = arith.cmpi ne, %1, %c0_i32_0 : i32
    scf.if %2 {
      %cst_13 = arith.constant 0.000000e+00 : f32
      %24 = vector.broadcast %cst_13 : f32 to vector<8x128xf32>
      %c0_14 = arith.constant 0 : index
      %c0_15 = arith.constant 0 : index
      %25 = vector.load %arg5[%c0_14, %c0_15] : memref<8x128xf32, #tpu.memory_space<vmem>>, vector<8x128xf32>
      tpu.vector_store %arg5[%c0_14, %c0_15], %24 {strides = array<i32>} : memref<8x128xf32, #tpu.memory_space<vmem>>, vector<8x128xf32>,
    } else {
    }
    %c0 = arith.constant 0 : index
    %c0_1 = arith.constant 0 : index
    %3 = vector.load %arg2[%c0, %c0_1] : memref<16x6xf32, #tpu.memory_space<vmem>>, vector<16x6xf32>
    %c0_2 = arith.constant 0 : index
    %c0_3 = arith.constant 0 : index
    %4 = vector.load %arg3[%c0_2, %c0_3] : memref<16x1xi32, #tpu.memory_space<vmem>>, vector<16x1xi32>
    %c0_4 = arith.constant 0 : index
    %c0_5 = arith.constant 0 : index
    %5 = vector.load %arg4[%c0_4, %c0_5] : memref<16x1xf32, #tpu.memory_space<vmem>>, vector<16x1xf32>
    %6 = tpu.iota {dimensions = array<i32: 1>} : vector<16x6xi32>
    %7 = vector.broadcast %4 : vector<16x1xi32> to vector<16x6xi32>
    %8 = arith.cmpi eq, %6, %7 : vector<16x6xi32>
    %cst = arith.constant 0.000000e+00 : f32
    %9 = vector.broadcast %cst : f32 to vector<16x6xf32>
    %10 = arith.select %8, %3, %9 : vector<16x6xi1>, vector<16x6xf32>
    %cst_6 = arith.constant dense<0.000000e+00> : vector<16xf32>
    %11 = vector.multi_reduction <add>, %10, %cst_6 [1] : vector<16x6xf32> to vector<16xf32>
    %12 = vector.shape_cast %11 : vector<16xf32> to vector<16x1xf32>
    %c0_7 = arith.constant 0 : index
    %c0_8 = arith.constant 0 : index
    %13 = vector.load %arg5[%c0_7, %c0_8] : memref<8x128xf32, #tpu.memory_space<vmem>>, vector<8x128xf32>
    %cst_9 = arith.constant 0.000000e+00 : f32
    %14 = vector.broadcast %cst_9 : f32 to vector<16x1xf32>
    %15 = arith.subf %14, %5 : vector<16x1xf32>
    %16 = arith.mulf %15, %12 : vector<16x1xf32>
    %17 = vector.shape_cast %16 : vector<16x1xf32> to vector<1x16x1xf32>
    %cst_10 = arith.constant dense<0.000000e+00> : vector<1xf32>
    %18 = vector.multi_reduction <add>, %17, %cst_10 [1, 2] : vector<1x16x1xf32> to vector<1xf32>
    %19 = vector.shape_cast %18 : vector<1xf32> to vector<1x1x1xf32>
    %20 = vector.extract %19[0, 0, 0] : f32 from vector<1x1x1xf32>
    %21 = vector.broadcast %20 : f32 to vector<8x128xf32>
    %22 = arith.addf %13, %21 : vector<8x128xf32>
    %c0_11 = arith.constant 0 : index
    %c0_12 = arith.constant 0 : index
    %23 = vector.load %arg5[%c0_11, %c0_12] : memref<8x128xf32, #tpu.memory_space<vmem>>, vector<8x128xf32>
    tpu.vector_store %arg5[%c0_11, %c0_12], %22 {strides = array<i32>} : memref<8x128xf32, #tpu.memory_space<vmem>>, vector<8x128xf32>,
    return
  }
  func.func @transform_0(%arg0: i32, %arg1: i32) -> (i32, i32) {
    %c1_i32 = arith.constant 1 : i32
    %0 = arith.muli %arg0, %c1_i32 : i32
    %1 = arith.addi %0, %arg1 : i32
    %c0_i32 = arith.constant 0 : i32
    %c0_i32_0 = arith.constant 0 : i32
    return %1, %c0_i32 : i32, i32
  }
  func.func @transform_1(%arg0: i32, %arg1: i32) -> (i32, i32) {
    %c1_i32 = arith.constant 1 : i32
    %0 = arith.muli %arg0, %c1_i32 : i32
    %1 = arith.addi %0, %arg1 : i32
    %c0_i32 = arith.constant 0 : i32
    %c0_i32_0 = arith.constant 0 : i32
    return %1, %c0_i32 : i32, i32
  }
  func.func @transform_2(%arg0: i32, %arg1: i32) -> (i32, i32) {
    %c1_i32 = arith.constant 1 : i32
    %0 = arith.muli %arg0, %c1_i32 : i32
    %1 = arith.addi %0, %arg1 : i32
    %c0_i32 = arith.constant 0 : i32
    %c0_i32_0 = arith.constant 0 : i32
    return %1, %c0_i32 : i32, i32
  }
  func.func @transform_3(%arg0: i32, %arg1: i32) -> (i32, i32) {
    %c0_i32 = arith.constant 0 : i32
    %c0_i32_0 = arith.constant 0 : i32
    return %c0_i32, %arg0 : i32, i32
  }
}

</mosaic_0001>

<bundles_post_ra>
// kernel: tpu_custom_call.1
= control target key start
LH: loop header
LB: loop body
LE: loop exit
PB: predicated region body
PF: predicated region fallthrough
CT: control target
= control target key end

     0   :  { %s246_s0 = inlined_call_operand.vmem [shape: f32[16,6], index: 0, kind: input, shape index: {}]   ;;  %s247_s1 = inlined_call_operand.vmem [shape: s32[16,1], index: 1, kind: input, shape index: {}]   ;;  %s248_s2 = inlined_call_operand.vmem [shape: f32[16,1], index: 2, kind: input, shape index: {}]   ;;  %s249_s3 = inlined_call_operand.hbm [shape: f32[8,128], index: 3, kind: output, shape index: {}]  }
   0x1   :  { %v88_v0 = vld [vmem:[%s247_s1] sm:$0xff] }
   0x2   :  { %8 = vsyncpa [#allocation3], 0  ;;  %v194_v1 = vmov 0   ;;  %v89_v2 = vld [vmem:[%s247_s1 + $0x8] sm:$0xff]  ;;  %v92_v3 = vlaneseq  ;;  %v86_v5 = vld [vmem:[%s246_s0] sm:$0xff]  ;;  %vm104_vm0 = vcmask 48128  }
   0x3   :  { %169 = vset.pattern.permute.xlu0 %v194_v1  ;;  %v87_v9 = vld [vmem:[%s246_s0 + $0x8] sm:$0xff]  ;;  %v90_v13 = vld [vmem:[%s248_s2] sm:$0xff]  ;;  %vm116_vm3 = vcmask 7168   ;;  %s195_s0 = smov [#allocation2]  }
   0x4   :  { %95 = vperm.xlu0 %169, %v88_v0   ;;  %v93_v4 = vand.u32 127, %v92_v3  ;;  %v91_v14 = vld [vmem:[%s248_s2 + $0x8] sm:$0xff]  ;;  %v112_v15 = vsub.f32 0.0, %v90_v13  ;;  %s138_s2 = sshll.u32 %s195_s0, 4  ;;  %s139_s2 = int_to_ptr.vmem [resolvable:$true] %s138_s2 }
   0x5   :  { %v113_v17 = vsub.f32 0.0, %v91_v14  ;;  %s170_s24 = scalar_lea.vmem %s139_s2, 128  ;;  %p175_p1 = scmp.lt.s32.totalorder %s139_s2, %s139_s2 }
   0x6   :  { %p171_p0 = scmp.ne.s32.totalorder %s139_s2, %s170_s24  ;;  %p176_p2 = scmp.lt.s32.totalorder %s170_s24, %s170_s24 }
   0x8   :  { %98 = vperm.xlu0 %169, %v89_v2   ;;  %p177_p3 = por %p176_p2, %p175_p1 }
   0xa   :  { %p178_p4 = pnand %p177_p3, %p171_p0 }
  0x83   :  { %v96_v6 = vpop.permute.xlu0 %95 }
  0x84   :  { %vm100_vm1 = vcmp.eq.s32.totalorder %v93_v4, %v96_v6 }
  0x85   :  { %v102_v7 = vsel %vm100_vm1, %v86_v5, 0.0 }
  0x86   :  { %v105_v8 = vsel %vm104_vm0, %v102_v7, 0.0 }
  0x87   :  { %v99_v10 = vpop.permute.xlu0 %98  ;;  %106 = vadd.xlane.f32.xlu1 %v105_v8 }
  0x88   :  { %vm101_vm2 = vcmp.eq.s32.totalorder %v93_v4, %v99_v10 }
  0x89   :  { %v103_v11 = vsel %vm101_vm2, %v87_v9, 0.0 }
  0x8a   :  { %v108_v12 = vsel %vm104_vm0, %v103_v11, 0.0 }
  0x8b   :  { %109 = vadd.xlane.f32.xlu1 %v108_v12 }
 0x114   :  { %v107_v16 = vpop.xlane.xlu1 %106 }
 0x115   :  { %v114_v18 = vmul.f32 %v112_v15, %v107_v16 }
 0x117   :  { %v117_v21 = vsel %vm116_vm3, %v114_v18, 0.0 }
 0x118   :  { %v110_v19 = vpop.xlane.xlu1 %109 }
 0x119   :  { %v115_v20 = vmul.f32 %v113_v17, %v110_v19 }
 0x11b   :  { %v118_v22 = vsel %vm116_vm3, %v115_v20, 0.0 }
 0x11c   :  { %v119_v23 = vadd.f32 %v118_v22, %v117_v21 }
 0x11e   :  { %120 = vadd.xlane.f32.xlu0 %v119_v23 }
 0x1ab   :  { %v121_v24 = vpop.xlane.xlu0 %120 }
 0x1ac   :  { %v122_v25 = vrot.slane %v121_v24, 4 }
 0x1ae   :  { %v123_v26 = vadd.f32 %v122_v25, %v121_v24 }
 0x1b0   :  { %v124_v27 = vrot.slane %v123_v26, 2 }
 0x1b2   :  { %v125_v28 = vadd.f32 %v124_v27, %v123_v26 }
 0x1b4   :  { %v126_v29 = vrot.slane %v125_v28, 1 }
 0x1b6   :  { %v127_v30 = vadd.f32 %v126_v29, %v125_v28 }
 0x1b8   :  { %164 = vpush %v127_v30 }
 0x1e9   :  { %s165_s23 = spop %164 }
 0x1ea   :  { %v129_v31 = vstv %s165_s23 }
 0x1eb   :  { %131 = vst [vmem:[#allocation2] sm:$0xff] %v129_v31 }
 0x1ec   :  { %181 = shalt.err (!%p178_p4)
}
 0x1ed   :  { %s182_s27 = scalar_lea.hbm %s249_s3, 128 }
 0x1ee   :  { %p183_p5 = scmp.ne.s32.totalorder %s249_s3, %s182_s27  ;;  %p186_p6 = scmp.lt.u32.totalorder %s182_s27, %s249_s3 }
 0x1f0   :  { %p188_p7 = pnand %p186_p6, %p183_p5 }
 0x1f2   :  { %191 = shalt.err (!%p188_p7)
}
 0x1f3   :  { %141 = dma.vmem_to_hbm [thread:$0]  %s139_s2, 128, %s249_s3, [#allocation3]  }
 0x1f4   :  { %192 = dma.done.wait [#allocation3], 128  }
 0x1f5   :  { %193 = vsyncadd [#allocation3], 4294967168 }
 0x1f6   :  { %145 = vsyncpa [#allocation3], 1 }

</bundles_post_ra>
